<compile_context>
chip_gen: v7x
topology: tpu7x:2x2x1
jax: 0.10.0
libtpu: 0.0.40
codegen_flags: <defaults>
</compile_context>

<pallas_src>
import jax
import jax.numpy as jnp
from jax.experimental import pallas as pl
from jax.experimental.pallas import tpu as pltpu


def _senet_kernel(x_ref, w1t_ref, w2t_ref, o_ref):
    # x_ref / o_ref: (Bt, C, HW)   w1t_ref: (C, Cr)   w2t_ref: (Cr, C)

    # Squeeze: spatial mean accumulated in f32, computed directly from the ref
    # so no block-sized f32 upcast stays live across the matmuls below.
    pooled = jnp.mean(x_ref[...].astype(jnp.float32), axis=-1)            # (Bt, C)

    # Excite MLP. Both contractions are over the RHS major (sublane) dim of the
    # pre-transposed resident weights -> no per-step XLU relayout.
    h = jnp.dot(pooled, w1t_ref[...], preferred_element_type=jnp.float32)  # (Bt, Cr)
    h = jnp.maximum(h, 0.0)
    s = jnp.dot(h, w2t_ref[...], preferred_element_type=jnp.float32)       # (Bt, C)
    s = jax.nn.sigmoid(s)

    # Scale: re-index x_ref so the load/upcast/mul/cast/store chain fuses
    # per-vreg (no live f32 block temp). Gate applied in f32 for accuracy.
    # (For bf16 inputs a native-bf16 multiply would halve VALU/ld/st work on
    # v6e/v7x at a small accuracy cost.)
    o_ref[...] = (x_ref[...].astype(jnp.float32) * s[:, :, None]).astype(o_ref.dtype)


def _physical_vmem_bytes():
    """Per-TensorCore VMEM of the current part; conservative 64 MiB fallback (v7x)."""
    try:
        cap = getattr(pltpu.get_tpu_info(), "vmem_capacity_bytes", None)
        if cap:
            return int(cap)
    except Exception:
        pass
    return 64 << 20


def _choose_batch_tile(B, per_batch_bytes, fixed_vmem_bytes, target_bytes, vmem_cap):
    """Pick a batch tile Bt (divisor of B), or None if even Bt=1 does not fit.

    Hard constraint: double-buffered input + output blocks plus the fixed
    (weights + intermediates) VMEM fit under vmem_cap.
    Preference order: >=4 *even* grid steps (>=2 per v7x TensorCore, amortizes
    pipeline ramp on single-TC v5e/v6e), then >=4 steps, then >=2 steps, then
    the largest block up to target_bytes.
    """
    divisors = [d for d in range(1, B + 1) if B % d == 0]
    feasible = [d for d in divisors
                if 4 * d * per_batch_bytes + fixed_vmem_bytes <= vmem_cap]
    if not feasible:
        return None
    fitting = [d for d in feasible if d * per_batch_bytes <= target_bytes]
    if not fitting:
        fitting = [min(feasible)]

    def pref(d):
        g = B // d
        return (g >= 4 and g % 2 == 0, g >= 4, g >= 2, d)

    return max(fitting, key=pref)


def senet_block(x, w1, w2):
    """SENetBlock forward.

    x:  (B, C, H, W)
    w1: (C//r, C)  -- PyTorch nn.Linear(channels, channels//r, bias=False) weight
    w2: (C, C//r)  -- PyTorch nn.Linear(channels//r, channels, bias=False) weight
    """
    B, C, H, W = x.shape
    HW = H * W
    Cr = w1.shape[0]
    itemsize = jnp.dtype(x.dtype).itemsize
    w_itemsize = jnp.dtype(w1.dtype).itemsize

    x_flat = x.reshape(B, C, HW)
    # One-time host-side transposes so the in-kernel contractions are over the
    # RHS sublane dim (weights stay resident; transpose cost is paid once).
    w1t = w1.T  # (C, Cr)
    w2t = w2.T  # (Cr, C)

    phys_vmem = _physical_vmem_bytes()
    vmem_cap = phys_vmem - (12 << 20)          # headroom for Mosaic internal scratch
    # Bigger blocks on 128 MiB parts (v5e/v6e); tighter on 64 MiB v7x.
    target_bytes = (12 << 20) if phys_vmem >= (96 << 20) else (4 << 20)

    weight_bytes = 2 * C * Cr * w_itemsize     # both matrices, single copy
    per_batch_bytes = C * HW * itemsize
    # Fixed VMEM: weights (allow for double-buffer fallback) + small intermediates.
    fixed_vmem = 2 * weight_bytes + (2 << 20)

    Bt = _choose_batch_tile(B, per_batch_bytes, fixed_vmem, target_bytes, vmem_cap)
    # TODO(synk): add a spatial-split (two-pass pool-accumulate then scale)
    # fallback for stages whose per-image block exceeds this part's VMEM, and a
    # channel-minor (Bt, HW, C) / NHWC variant for stages whose HW is not a
    # multiple of 128 (49/196/784) to avoid masked partial stores.
    assert Bt is not None, (
        f"SE block of {per_batch_bytes} bytes/image does not fit the single-pass "
        f"VMEM path on this part ({phys_vmem} bytes physical VMEM)")

    grid = (B // Bt,)
    block_bytes = Bt * per_batch_bytes
    vmem_needed = 4 * block_bytes + fixed_vmem          # 2x in + 2x out + fixed
    vmem_limit = int(min(max(vmem_needed, 32 << 20), vmem_cap))

    cost = pl.CostEstimate(
        flops=2 * B * C * HW + 4 * B * C * Cr,
        transcendentals=B * C,
        bytes_accessed=2 * B * C * HW * itemsize + weight_bytes,
    )

    x_spec = pl.BlockSpec((Bt, C, HW), lambda b: (b, 0, 0))
    out_spec = pl.BlockSpec((Bt, C, HW), lambda b: (b, 0, 0))

    def build(single_buffer_weights):
        w_kwargs = {}
        if single_buffer_weights:
            w_kwargs = dict(pipeline_mode=pl.Buffered(1))
        try:
            w1_spec = pl.BlockSpec((C, Cr), lambda b: (0, 0), **w_kwargs)
            w2_spec = pl.BlockSpec((Cr, C), lambda b: (0, 0), **w_kwargs)
        except TypeError:
            w1_spec = pl.BlockSpec((C, Cr), lambda b: (0, 0))
            w2_spec = pl.BlockSpec((Cr, C), lambda b: (0, 0))
        return pl.pallas_call(
            _senet_kernel,
            out_shape=jax.ShapeDtypeStruct((B, C, HW), x.dtype),
            grid_spec=pltpu.PrefetchScalarGridSpec(
                num_scalar_prefetch=0,
                grid=grid,
                in_specs=[x_spec, w1_spec, w2_spec],
                out_specs=out_spec,
            ),
            compiler_params=pltpu.CompilerParams(
                dimension_semantics=("parallel",),
                vmem_limit_bytes=vmem_limit,
            ),
            cost_estimate=cost,
        )

    try:
        out_flat = build(single_buffer_weights=True)(x_flat, w1t, w2t)
    except Exception:
        # pl.Buffered(1) on resident weights not supported by this jax version;
        # fall back to default double buffering (costs ~weight_bytes extra VMEM).
        out_flat = build(single_buffer_weights=False)(x_flat, w1t, w2t)

    return out_flat.reshape(B, C, H, W)


def senet_block_ref(x, w1, w2):
    """Pure-JAX reference matching the PyTorch forward."""
    y = jnp.mean(x.astype(jnp.float32), axis=(2, 3))     # AdaptiveAvgPool2d(1) -> (B, C)
    y = jnp.maximum(y @ w1.T, 0.0)                       # (B, C//r)
    y = jax.nn.sigmoid(y @ w2.T)                         # (B, C)
    return (x.astype(jnp.float32) * y[:, :, None, None]).astype(x.dtype)


if __name__ == "__main__":
    # Small shapes consistent with the module: channels divisible by reduction=8.
    B, C, H, W = 2, 16, 16, 16
    reduction = 8
    Cr = C // reduction

    key = jax.random.PRNGKey(0)
    kx, k1, k2 = jax.random.split(key, 3)
    x = jax.random.normal(kx, (B, C, H, W), dtype=jnp.float32)
    # Deterministic synthetic weights in PyTorch nn.Linear layout (out, in).
    w1 = jax.random.normal(k1, (Cr, C), dtype=jnp.float32) * 0.1
    w2 = jax.random.normal(k2, (C, Cr), dtype=jnp.float32) * 0.1

    out = jax.block_until_ready(senet_block(x, w1, w2))
    ref = senet_block_ref(x, w1, w2)

    assert out.shape == (B, C, H, W)
    assert jnp.allclose(out, ref, atol=1e-5, rtol=1e-5), "mismatch vs reference"

    print("KERNEL_OK")
</pallas_src>

<mosaic_0001>
module attributes {stable_mosaic.version = 11 : i64} {
  func.func @_senet_kernel(%arg0: i32, %arg1: memref<1x16x256xf32, #tpu.memory_space<vmem>>, %arg2: memref<16x2xf32, #tpu.memory_space<vmem>>, %arg3: memref<2x16xf32, #tpu.memory_space<vmem>>, %arg4: memref<1x16x256xf32, #tpu.memory_space<vmem>>) attributes {dimension_semantics = [#tpu.dimension_semantics<parallel>], iteration_bounds = array<i64: 2>, scalar_prefetch = 0 : i64, scratch_operands = 0 : i64, tpu.core_type = #tpu.core_type<tc>, window_params = [{transform_indices = @transform_0, window_bounds = array<i64: 1, 16, 256>}, {pipeline_mode = #tpu.pipeline_mode<synchronous>, transform_indices = @transform_1, window_bounds = array<i64: 16, 2>}, {pipeline_mode = #tpu.pipeline_mode<synchronous>, transform_indices = @transform_2, window_bounds = array<i64: 2, 16>}, {transform_indices = @transform_3, window_bounds = array<i64: 1, 16, 256>}]} {
    %c0 = arith.constant 0 : index
    %c0_0 = arith.constant 0 : index
    %c0_1 = arith.constant 0 : index
    %0 = vector.load %arg1[%c0, %c0_0, %c0_1] : memref<1x16x256xf32, #tpu.memory_space<vmem>>, vector<1x16x256xf32>
    %cst = arith.constant dense<0.000000e+00> : vector<1x16xf32>
    %1 = vector.multi_reduction <add>, %0, %cst [2] : vector<1x16x256xf32> to vector<1x16xf32>
    %cst_2 = arith.constant 2.560000e+02 : f32
    %2 = vector.broadcast %cst_2 : f32 to vector<1x16xf32>
    %3 = arith.divf %1, %2 : vector<1x16xf32>
    %c0_3 = arith.constant 0 : index
    %c0_4 = arith.constant 0 : index
    %4 = vector.load %arg2[%c0_3, %c0_4] : memref<16x2xf32, #tpu.memory_space<vmem>>, vector<16x2xf32>
    %cst_5 = arith.constant dense<0.000000e+00> : vector<1x2xf32>
    %5 = tpu.matmul %3, %4, %cst_5 {dimension_numbers = #tpu.dot_dimension_numbers<[1], [0], [0], [1], [0, 0, 1, 1], [], []>} : vector<1x16xf32>, vector<16x2xf32>, vector<1x2xf32> -> vector<1x2xf32>
    %cst_6 = arith.constant 0.000000e+00 : f32
    %6 = vector.broadcast %cst_6 : f32 to vector<1x2xf32>
    %7 = arith.maximumf %5, %6 : vector<1x2xf32>
    %c0_7 = arith.constant 0 : index
    %c0_8 = arith.constant 0 : index
    %8 = vector.load %arg3[%c0_7, %c0_8] : memref<2x16xf32, #tpu.memory_space<vmem>>, vector<2x16xf32>
    %cst_9 = arith.constant dense<0.000000e+00> : vector<1x16xf32>
    %9 = tpu.matmul %7, %8, %cst_9 {dimension_numbers = #tpu.dot_dimension_numbers<[1], [0], [0], [1], [0, 0, 1, 1], [], []>} : vector<1x2xf32>, vector<2x16xf32>, vector<1x16xf32> -> vector<1x16xf32>
    %10 = arith.negf %9 : vector<1x16xf32>
    %11 = math.exp %10 : vector<1x16xf32>
    %cst_10 = arith.constant 1.000000e+00 : f32
    %12 = vector.broadcast %cst_10 : f32 to vector<1x16xf32>
    %13 = arith.addf %12, %11 : vector<1x16xf32>
    %14 = arith.divf %12, %13 : vector<1x16xf32>
    %c0_11 = arith.constant 0 : index
    %c0_12 = arith.constant 0 : index
    %c0_13 = arith.constant 0 : index
    %15 = vector.load %arg1[%c0_11, %c0_12, %c0_13] : memref<1x16x256xf32, #tpu.memory_space<vmem>>, vector<1x16x256xf32>
    %16 = vector.shape_cast %14 : vector<1x16xf32> to vector<1x16x1xf32>
    %17 = vector.broadcast %16 : vector<1x16x1xf32> to vector<1x16x256xf32>
    %18 = arith.mulf %15, %17 : vector<1x16x256xf32>
    %c0_14 = arith.constant 0 : index
    %c0_15 = arith.constant 0 : index
    %c0_16 = arith.constant 0 : index
    %19 = vector.load %arg4[%c0_14, %c0_15, %c0_16] : memref<1x16x256xf32, #tpu.memory_space<vmem>>, vector<1x16x256xf32>
    tpu.vector_store %arg4[%c0_14, %c0_15, %c0_16], %18 {strides = array<i32>} : memref<1x16x256xf32, #tpu.memory_space<vmem>>, vector<1x16x256xf32>,
    return
  }
  func.func @transform_0(%arg0: i32) -> (i32, i32, i32) {
    %c0_i32 = arith.constant 0 : i32
    %c0_i32_0 = arith.constant 0 : i32
    %c0_i32_1 = arith.constant 0 : i32
    return %arg0, %c0_i32, %c0_i32_0 : i32, i32, i32
  }
  func.func @transform_1(%arg0: i32) -> (i32, i32) {
    %c0_i32 = arith.constant 0 : i32
    %c0_i32_0 = arith.constant 0 : i32
    %c0_i32_1 = arith.constant 0 : i32
    return %c0_i32, %c0_i32_0 : i32, i32
  }
  func.func @transform_2(%arg0: i32) -> (i32, i32) {
    %c0_i32 = arith.constant 0 : i32
    %c0_i32_0 = arith.constant 0 : i32
    %c0_i32_1 = arith.constant 0 : i32
    return %c0_i32, %c0_i32_0 : i32, i32
  }
  func.func @transform_3(%arg0: i32) -> (i32, i32, i32) {
    %c0_i32 = arith.constant 0 : i32
    %c0_i32_0 = arith.constant 0 : i32
    %c0_i32_1 = arith.constant 0 : i32
    return %arg0, %c0_i32, %c0_i32_0 : i32, i32, i32
  }
}

module attributes {stable_mosaic.version = 11 : i64} {
  func.func @_senet_kernel(%arg0: i32, %arg1: memref<1x16x256xf32, #tpu.memory_space<vmem>>, %arg2: memref<16x2xf32, #tpu.memory_space<vmem>>, %arg3: memref<2x16xf32, #tpu.memory_space<vmem>>, %arg4: memref<1x16x256xf32, #tpu.memory_space<vmem>>) attributes {dimension_semantics = [#tpu.dimension_semantics<parallel>], iteration_bounds = array<i64: 2>, scalar_prefetch = 0 : i64, scratch_operands = 0 : i64, tpu.core_type = #tpu.core_type<tc>, window_params = [{transform_indices = @transform_0, window_bounds = array<i64: 1, 16, 256>}, {pipeline_mode = #tpu.pipeline_mode<synchronous>, transform_indices = @transform_1, window_bounds = array<i64: 16, 2>}, {pipeline_mode = #tpu.pipeline_mode<synchronous>, transform_indices = @transform_2, window_bounds = array<i64: 2, 16>}, {transform_indices = @transform_3, window_bounds = array<i64: 1, 16, 256>}]} {
    %c0 = arith.constant 0 : index
    %c0_0 = arith.constant 0 : index
    %c0_1 = arith.constant 0 : index
    %0 = vector.load %arg1[%c0, %c0_0, %c0_1] : memref<1x16x256xf32, #tpu.memory_space<vmem>>, vector<1x16x256xf32>
    %cst = arith.constant dense<0.000000e+00> : vector<1x16xf32>
    %1 = vector.multi_reduction <add>, %0, %cst [2] : vector<1x16x256xf32> to vector<1x16xf32>
    %cst_2 = arith.constant 2.560000e+02 : f32
    %2 = vector.broadcast %cst_2 : f32 to vector<1x16xf32>
    %3 = arith.divf %1, %2 : vector<1x16xf32>
    %c0_3 = arith.constant 0 : index
    %c0_4 = arith.constant 0 : index
    %4 = vector.load %arg2[%c0_3, %c0_4] : memref<16x2xf32, #tpu.memory_space<vmem>>, vector<16x2xf32>
    %cst_5 = arith.constant dense<0.000000e+00> : vector<1x2xf32>
    %5 = tpu.matmul %3, %4, %cst_5 {dimension_numbers = #tpu.dot_dimension_numbers<[1], [0], [0], [1], [0, 0, 1, 1], [], []>} : vector<1x16xf32>, vector<16x2xf32>, vector<1x2xf32> -> vector<1x2xf32>
    %cst_6 = arith.constant 0.000000e+00 : f32
    %6 = vector.broadcast %cst_6 : f32 to vector<1x2xf32>
    %7 = arith.maximumf %5, %6 : vector<1x2xf32>
    %c0_7 = arith.constant 0 : index
    %c0_8 = arith.constant 0 : index
    %8 = vector.load %arg3[%c0_7, %c0_8] : memref<2x16xf32, #tpu.memory_space<vmem>>, vector<2x16xf32>
    %cst_9 = arith.constant dense<0.000000e+00> : vector<1x16xf32>
    %9 = tpu.matmul %7, %8, %cst_9 {dimension_numbers = #tpu.dot_dimension_numbers<[1], [0], [0], [1], [0, 0, 1, 1], [], []>} : vector<1x2xf32>, vector<2x16xf32>, vector<1x16xf32> -> vector<1x16xf32>
    %10 = arith.negf %9 : vector<1x16xf32>
    %11 = math.exp %10 : vector<1x16xf32>
    %cst_10 = arith.constant 1.000000e+00 : f32
    %12 = vector.broadcast %cst_10 : f32 to vector<1x16xf32>
    %13 = arith.addf %12, %11 : vector<1x16xf32>
    %14 = arith.divf %12, %13 : vector<1x16xf32>
    %c0_11 = arith.constant 0 : index
    %c0_12 = arith.constant 0 : index
    %c0_13 = arith.constant 0 : index
    %15 = vector.load %arg1[%c0_11, %c0_12, %c0_13] : memref<1x16x256xf32, #tpu.memory_space<vmem>>, vector<1x16x256xf32>
    %16 = vector.shape_cast %14 : vector<1x16xf32> to vector<1x16x1xf32>
    %17 = vector.broadcast %16 : vector<1x16x1xf32> to vector<1x16x256xf32>
    %18 = arith.mulf %15, %17 : vector<1x16x256xf32>
    %c0_14 = arith.constant 0 : index
    %c0_15 = arith.constant 0 : index
    %c0_16 = arith.constant 0 : index
    %19 = vector.load %arg4[%c0_14, %c0_15, %c0_16] : memref<1x16x256xf32, #tpu.memory_space<vmem>>, vector<1x16x256xf32>
    tpu.vector_store %arg4[%c0_14, %c0_15, %c0_16], %18 {strides = array<i32>} : memref<1x16x256xf32, #tpu.memory_space<vmem>>, vector<1x16x256xf32>,
    return
  }
  func.func @transform_0(%arg0: i32) -> (i32, i32, i32) {
    %c0_i32 = arith.constant 0 : i32
    %c0_i32_0 = arith.constant 0 : i32
    %c0_i32_1 = arith.constant 0 : i32
    return %arg0, %c0_i32, %c0_i32_0 : i32, i32, i32
  }
  func.func @transform_1(%arg0: i32) -> (i32, i32) {
    %c0_i32 = arith.constant 0 : i32
    %c0_i32_0 = arith.constant 0 : i32
    %c0_i32_1 = arith.constant 0 : i32
    return %c0_i32, %c0_i32_0 : i32, i32
  }
  func.func @transform_2(%arg0: i32) -> (i32, i32) {
    %c0_i32 = arith.constant 0 : i32
    %c0_i32_0 = arith.constant 0 : i32
    %c0_i32_1 = arith.constant 0 : i32
    return %c0_i32, %c0_i32_0 : i32, i32
  }
  func.func @transform_3(%arg0: i32) -> (i32, i32, i32) {
    %c0_i32 = arith.constant 0 : i32
    %c0_i32_0 = arith.constant 0 : i32
    %c0_i32_1 = arith.constant 0 : i32
    return %arg0, %c0_i32, %c0_i32_0 : i32, i32, i32
  }
}

</mosaic_0001>

<bundles_post_ra>
// kernel: tpu_custom_call.1
= control target key start
LH: loop header
LB: loop body
LE: loop exit
PB: predicated region body
PF: predicated region fallthrough
CT: control target
= control target key end

     0   :  { %8 = vsyncpa [#allocation3], 0  ;;  %s891_s0 = inlined_call_operand.hbm [shape: f32[2,16,256], index: 0, kind: input, shape index: {}]   ;;  %s892_s1 = inlined_call_operand.vmem [shape: f32[16,2], index: 1, kind: input, shape index: {}]   ;;  %s893_s2 = inlined_call_operand.vmem [shape: f32[2,16], index: 2, kind: input, shape index: {}]   ;;  %s894_s3 = inlined_call_operand.hbm [shape: f32[2,16,256], index: 3, kind: output, shape index: {}]  }
   0x1   :  { %10 = vsyncpa [#allocation3 + $0x1], 0 }
   0x2   :  { %11 = vsyncpa [#allocation4], 0 }
   0x3   :  { %13 = vsyncpa [#allocation4 + $0x1], 0  ;;  %s708_s12 = smov 0   ;;  %s710_s13 = smov 0  }
   0x4   :  { %s712_s14 = smov 0   ;;  %s714_s15 = smov 0  }
   0x5 LB: > { %s729_s16 = sadd.s32 4294967295, %s677_s15   ;;  %s484_s17 = sadd.s32 4294967294, %s677_s15   ;;  %s677_s15 = sphi %s714_s15, %s907_s15   ;;  %s673_s14 = sphi %s712_s14, %s906_s14   ;;  %s669_s13 = sphi %s710_s13, %s905_s13   ;;  %s665_s12 = sphi %s708_s12, %s904_s12  }
   0x6   : > { %s733_s18 = sadd.s32 1, %s677_s15   ;;  %s26_s19 = sadd.s32 1, %s673_s14 }
   0x7   : > { %s23_s20 = ssub.s32 %s677_s15, %s733_s18  ;;  %p33_p0 = scmp.ne.s32.totalorder %s673_s14, %s669_s13 }
   0x8   : > { %p24_p1 = scmp.eq.s32.totalorder %s23_s20, 0  ;;  %p34_p2 = scmp.eq.s32.totalorder %s677_s15, 0 }
   0x9   : > { %p39_p3 = scmp.ne.s32.totalorder %s669_s13, %s665_s12  ;;  %p40_p4 = scmp.eq.s32.totalorder %s729_s16, 0 }
   0xa   : > { %s745_s21 = scalar_select %p24_p1, %s673_s14, %s26_s19  }
   0xb   : > { %p747_p5 = por %p34_p2, %p33_p0  ;;  %p751_p6 = por %p40_p4, %p39_p3 }
   0xc   : > { %p105_p7 = scmp.eq.s32.totalorder %s729_s16, 1  ;;  %p111_p8 = scmp.eq.s32.totalorder %s484_s17, 1 }
   0xd   : > { %p536_p10 = scmp.lt.s32.totalorder %s677_s15, 2  ;;  %s137_s26 = sand.u32 1, %s673_s14  }
   0xe   : > { %p758_p11 = por %p105_p7, %p33_p0  ;;  %p762_p12 = por %p111_p8, %p39_p3 }
   0xf   : > { %s502_s27 = sshll.u32 %s677_s15, 9  ;;  %s487_s28 = sshll.u32 %s137_s26, 5 }
  0x10   : > { %s898_s24 = scalar_select %p758_p11, 1, 0 }
  0x11   : > { %s899_s25 = scalar_select %p762_p12, 1, 0 }
  0x12   : > { %s771_s4 = scalar_lea.hbm %s891_s0, %s502_s27  ;;  %s141_s5 = scalar_lea.vmem [#allocation2], %s487_s28 }
  0x13   : > { %s148_s6 = sshll.u32 %s141_s5, 4  ;;  %p775_p13 = pnand %p536_p10, %p747_p5  ;;  %s779_s6 = int_to_ptr.vmem [resolvable:$true] %s148_s6 }
  0x14   : > { %s781_s8 = scalar_lea.sflag [#allocation3], %s137_s26  ;;  %s581_s9 = scalar_lea.hbm %s771_s4, 512 }
  0x15   : > { %p582_p0 = scmp.ne.s32.totalorder %s771_s4, %s581_s9  ;;  %p583_p1 = pneg %p775_p13 }
  0x16   : > { %s586_s17 = scalar_lea.hbm %s891_s0, 1024  ;;  %p587_p4 = scmp.lt.u32.totalorder %s771_s4, %s891_s0 }
  0x17   : > { %p584_p2 = pnand %p583_p1, %p582_p0  ;;  %p588_p5 = scmp.lt.u32.totalorder %s586_s17, %s581_s9 }
  0x18   : > { %p590_p8 = scmp.lt.u32.totalorder %s581_s9, %s771_s4 }
  0x19   : > { %p585_p3 = pneg %p584_p2  ;;  %p589_p7 = por %p588_p5, %p587_p4 }
  0x1b   : > { %p591_p10 = por %p590_p8, %p589_p7 }
  0x1d   : > { %p592_p9 = pnand %p591_p10, %p585_p3 }
  0x1f   : > { %595 = shalt.err (!%p592_p9)
}
  0x20   : > { %s596_s22 = scalar_lea.vmem %s779_s6, 512  ;;  %s679_s26 = smov [#allocation2]  }
  0x21   : > { %p597_p0 = scmp.ne.s32.totalorder %s779_s6, %s596_s22  ;;  %s601_s27 = sshll.u32 %s679_s26, 4  ;;  %s602_s27 = int_to_ptr.vmem [resolvable:$false] %s601_s27 }
  0x22   : > { %s603_s28 = scalar_lea.vmem %s602_s27, 1024  ;;  %p604_p11 = scmp.lt.s32.totalorder %s779_s6, %s602_s27 }
  0x23   : > { %p599_p2 = pnand %p597_p0, %p583_p1  ;;  %p605_p4 = scmp.lt.s32.totalorder %s603_s28, %s596_s22 }
  0x25   : > { %p600_p12 = pneg %p599_p2  ;;  %p606_p5 = por %p605_p4, %p604_p11 }
  0x27   : > { %p607_p7 = pnand %p606_p5, %p600_p12 }
  0x29   : > { %610 = shalt.err (!%p607_p7)
}
  0x2a   : > { %s680_s29 = smov 256   ;;  %s681_s30 = smov 16  }
  0x2b   : > { %531 = dma.hbm_to_vmem [thread:$0]  (!%p775_p13), %s771_s4, 512, %s779_s6, %s781_s8, %s680_s29, %s680_s29, %s681_s30  }
  0x2c   : > { %p490_p9 = scmp.ge.s32.totalorder %s677_s15, 1  ;;  %p156_p1 = scmp.lt.s32.totalorder %s677_s15, 3 }
  0x2e   : > { %p157_p3 = pnand %p490_p9, %p156_p1 }
  0x2f   : > { %s812_s5 = sand.u32 (!%p157_p3), 1, %s669_s13  }
  0x30   : > { %160 = sbr.rel (%p157_p3) target bundleno = 800 (0x320), region = 32  ;;  %s491_s9 = sshll.u32 (!%p157_p3), %s812_s5, 5 }
  0x31   : > { %s163_s10 = scalar_lea.sflag (!%p157_p3), [#allocation3], %s812_s5  ;;  %s166_s11 = scalar_lea.vmem (!%p157_p3), [#allocation2], %s491_s9 }
  0x37   : > { %656 = dma.done.wait (%p751_p6), %s163_s10, 512  }
  0x38   : > { %658 = vsyncadd (%p751_p6), %s163_s10, 4294966784  ;;  %v189_v0 = vld [vmem:[%s166_s11] sm:$0xff]  ;;  %v190_v1 = vld [vmem:[%s166_s11 + $0x8] sm:$0xff]  ;;  %v682_v9 = vmov 0.0|0.0   ;;  %vm683_vm0 = vmmov 0   ;;  %v684_v10 = vmov 0.0   ;;  %v206_v11 = vlaneseq }
  0x39   : > { %v822_v2 = vld [vmem:[%s166_s11 + $0x10] sm:$0xff]  ;;  %v193_v3 = vadd.f32 %v190_v1, %v189_v0  ;;  %v824_v4 = vld [vmem:[%s166_s11 + $0x18] sm:$0xff]  ;;  %v202_v6 = vld [vmem:[%s892_s1] sm:$0xff]  ;;  %521 = vmatprep.subr.bf16.mxu0 %v682_v9  ;;  %513 = vmatprep.mubr.msk.f32.mxu0 %vm683_vm0, %v684_v10  ;;  %vm217_vm1 = vcmask 130112   ;;  %vm219_vm2 = vcmask 130048   ;;  %vm298_vm3 = vcmask 1041408  }
  0x3a   : > { %v196_v5 = vadd.f32 %v824_v4, %v822_v2  ;;  %v203_v7 = vld [vmem:[%s892_s1 + $0x8] sm:$0xff]  ;;  %516 = vmatprep.subr.mxu1 %v684_v10  ;;  %518 = vmatprep.mubr.msk.f32.mxu1 %vm683_vm0, %v684_v10  ;;  %v207_v12 = vand.u32 127, %v206_v11  ;;  %v209_v13 = vshrl.u32 %v206_v11, 7  ;;  %v293_v24 = vld [vmem:[%s893_s2] sm:$0x3]  ;;  %vm294_vm4 = vcmask 15360  }
  0x3b   : > { %194 = vadd.xlane.f32.xlu0 %v193_v3  ;;  %v522_v8 = vpack.c.bf16 %v203_v7, %v202_v6  ;;  %517 = vmatpush3.msk.msra.mxu1 %vm298_vm3, %v293_v24  ;;  %s188_s19 = scalar_lea.vmem [#allocation5], %s491_s9  ;;  %s503_s22 = sshll.u32 %s729_s16, 9 }
  0x3c   : > { %v212_v14 = vadd.s32 4294967288, %v207_v12  ;;  %v210_v16 = vsub.s32 %v207_v12, %v209_v13  ;;  %v380_v33 = vsub.s32 0, %v209_v13  ;;  %s411_s20 = sshll.u32 %s188_s19, 4  ;;  %s845_s28 = scalar_lea.hbm %s894_s3, %s503_s22  ;;  %s840_s20 = int_to_ptr.vmem [resolvable:$true] %s411_s20 }
  0x3d   : > { %523 = vmatpush3.bf16.msra.mxu0 %v522_v8  ;;  %s398_s16 = scalar_lea.sflag [#allocation4], %s812_s5  ;;  %s611_s29 = scalar_lea.vmem %s840_s20, 512 }
  0x3e   : > { %v215_v18 = vsub.s32 %v212_v14, %v209_v13  ;;  %p612_p6 = scmp.ne.s32.totalorder %s840_s20, %s611_s29  ;;  %p901_p11 = scmp.ne.s32.totalorder %s898_s24, 0 }
  0x3f   : > { %197 = vadd.xlane.f32.xlu0 %v196_v5  ;;  %s685_s30 = smov [#allocation5]  }
  0x40   : > { %p613_p12 = pnand %p612_p6, %p901_p11  ;;  %s615_s9 = sshll.u32 %s685_s30, 4  ;;  %s616_s9 = int_to_ptr.vmem [resolvable:$false] %s615_s9 }
  0x41   : > { %s617_s10 = scalar_lea.vmem %s616_s9, 1024  ;;  %p618_p8 = scmp.lt.s32.totalorder %s840_s20, %s616_s9 }
  0x42   : > { %p614_p13 = pneg %p613_p12  ;;  %p619_p10 = scmp.lt.s32.totalorder %s617_s10, %s611_s29 }
  0x44   : > { %p620_p0 = por %p619_p10, %p618_p8 }
  0x46   : > { %p621_p2 = pnand %p620_p0, %p614_p13 }
  0xc8   : > { %v195_v15 = vpop.xlane.xlu0 %194 }
  0xc9   : > { %v200_v17 = vmul.f32 0.00390625, %v195_v15 }
  0xcb   : > { %v211_v21 = vrot.slane %v200_v17, %v210_v16 }
  0xcc   : > { %v198_v19 = vpop.xlane.xlu0 %197 }
  0xcd   : > { %v201_v20 = vmul.f32 0.00390625, %v198_v19 }
  0xcf   : > { %v216_v22 = vrot.slane %v201_v20, %v215_v18 }
  0xd1   : > { %v218_v23 = vsel %vm217_vm1, %v216_v22, %v211_v21 }
  0xd2   : > { %514 = vmatmul.mubr.msk.f32.vlgmr.msra.gmra.mrb[0].mxu0 %vm219_vm2, %v218_v23 }
 0x1a5   : > { %v288_v25 = vpop.f32.mrb[0].mxu0 }
 0x1a6   : > { %v292_v26 = vmax.f32 %v288_v25, 0.0  ;;  %v515_v27 = vpop.f32.mrb[1].mxu0 }
 0x1a8   : > { %519 = vmatmul.mubr.msk.f32.vlgmr.msra.gmra.mrb[0].mxu1 %vm294_vm4, %v292_v26 }
 0x27b   : > { %v368_v28 = vpop.f32.mrb[0].mxu1 }
 0x27c   : > { %v496_v29 = vmul.f32 -1.442695, %v368_v28  ;;  %v520_v30 = vpop.f32.mrb[1].mxu1 }
 0x27e   : > { %577 = vpow2.f32 %v496_v29 }
 0x288   : > { %v578_v31 = vpop.eup %577 }
 0x289   : > { %v375_v32 = vadd.f32 1.0, %v578_v31 }
 0x28b   : > { %579 = vrcp.f32 %v375_v32 }
 0x295   : > { %v580_v34 = vpop.eup %579 }
 0x296   : > { %v381_v35 = vrot.slane %v580_v34, %v380_v33 }
 0x298   : > { %383 = vbcast.lane.b32.xlu1 %v381_v35, 256 }
 0x29c   : > { %387 = vbcast.lane.b32.xlu1 %v381_v35, 264 }
 0x30a   : > { %v384_v36 = vpop.permute.xlu1 %383 }
 0x30b   : > { %v389_v37 = vmul.f32 %v384_v36, %v189_v0  ;;  %v390_v38 = vmul.f32 %v384_v36, %v190_v1 }
 0x30d   : > { %393 = vst [vmem:[%s188_s19] sm:$0xff] %v389_v37  ;;  %394 = vst [vmem:[%s188_s19 + $0x8] sm:$0xff] %v390_v38 }
 0x30e   : > { %v388_v39 = vpop.permute.xlu1 %387 }
 0x30f   : > { %v391_v40 = vmul.f32 %v388_v39, %v822_v2  ;;  %v392_v41 = vmul.f32 %v388_v39, %v824_v4 }
 0x311   : > { %395 = vst [vmem:[%s188_s19 + $0x10] sm:$0xff] %v391_v40  ;;  %396 = vst [vmem:[%s188_s19 + $0x18] sm:$0xff] %v392_v41 }
 0x312   : > { %624 = shalt.err (!%p621_p2)
}
 0x313   : > { %s625_s11 = scalar_lea.hbm %s845_s28, 512  ;;  %s629_s7 = scalar_lea.hbm %s894_s3, 1024 }
 0x314   : > { %p626_p4 = scmp.ne.s32.totalorder %s845_s28, %s625_s11  ;;  %p630_p9 = scmp.lt.u32.totalorder %s845_s28, %s894_s3 }
 0x315   : > { %p631_p1 = scmp.lt.u32.totalorder %s629_s7, %s625_s11  ;;  %p633_p6 = scmp.lt.u32.totalorder %s625_s11, %s845_s28 }
 0x316   : > { %p627_p5 = pnand %p626_p4, %p901_p11 }
 0x317   : > { %p632_p3 = por %p631_p1, %p630_p9 }
 0x318   : > { %p628_p7 = pneg %p627_p5 }
 0x319   : > { %p634_p12 = por %p633_p6, %p632_p3 }
 0x31b   : > { %p635_p13 = pnand %p634_p12, %p628_p7 }
 0x31d   : > { %638 = shalt.err (!%p635_p13)
}
 0x31e   : > { %s686_s17 = smov 256   ;;  %s687_s19 = smov 16  }
 0x31f   : > { %526 = dma.vmem_to_hbm [thread:$0]  (%p901_p11), %s840_s20, 512, %s845_s28, %s398_s16, %s686_s17, %s686_s17, %s687_s19  }
 0x320 PF: > { %s426_s22 = sand.u32 1, %s665_s12   ;;  %p902_p8 = scmp.ne.s32.totalorder %s899_s25, 0 }
 0x321   : > { %p903_p10 = scmp.ge.s32.totalorder %s677_s15, 2  ;;  %s427_s26 = scalar_lea.sflag [#allocation4], %s426_s22 }
 0x323   : > { %p533_p0 = pnand %p903_p10, %p902_p8 }
 0x325   : > { %660 = dma.done.wait (!%p533_p0), %s427_s26, 512  }
 0x326   : > { %662 = vsyncadd (!%p533_p0), %s427_s26, 4294966784  ;;  %p16_p2 = scmp.ge.s32.totalorder %s733_s18, 4   ;;  %s904_s12 = smov %s669_s13 }
 0x327   : > { %s905_s13 = smov %s673_s14  ;;  %s906_s14 = smov %s745_s21 }
 0x328   : > { %s907_s15 = smov %s733_s18  ;;  %18 = sbr.rel (!%p16_p2) target bundleno = 5 (0x5), region = 77 }
 0x32f   :  { %432 = vsyncpa [#allocation3], 1 }
 0x330   :  { %434 = vsyncpa [#allocation3 + $0x1], 1 }
 0x331   :  { %435 = vsyncpa [#allocation4], 1 }
 0x332   :  { %437 = vsyncpa [#allocation4 + $0x1], 1 }

// kernel: tpu_custom_call.1
= control target key start
LH: loop header
LB: loop body
LE: loop exit
PB: predicated region body
PF: predicated region fallthrough
CT: control target
= control target key end

     0   :  { %8 = vsyncpa [#allocation3], 0  ;;  %s891_s0 = inlined_call_operand.hbm [shape: f32[2,16,256], index: 0, kind: input, shape index: {}]   ;;  %s892_s1 = inlined_call_operand.vmem [shape: f32[16,2], index: 1, kind: input, shape index: {}]   ;;  %s893_s2 = inlined_call_operand.vmem [shape: f32[2,16], index: 2, kind: input, shape index: {}]   ;;  %s894_s3 = inlined_call_operand.hbm [shape: f32[2,16,256], index: 3, kind: output, shape index: {}]  }
   0x1   :  { %10 = vsyncpa [#allocation3 + $0x1], 0 }
   0x2   :  { %11 = vsyncpa [#allocation4], 0 }
   0x3   :  { %13 = vsyncpa [#allocation4 + $0x1], 0  ;;  %s708_s12 = smov 0   ;;  %s710_s13 = smov 0  }
   0x4   :  { %s712_s14 = smov 0   ;;  %s714_s15 = smov 0  }
   0x5 LB: > { %s729_s16 = sadd.s32 4294967295, %s677_s15   ;;  %s484_s17 = sadd.s32 4294967294, %s677_s15   ;;  %s677_s15 = sphi %s714_s15, %s907_s15   ;;  %s673_s14 = sphi %s712_s14, %s906_s14   ;;  %s669_s13 = sphi %s710_s13, %s905_s13   ;;  %s665_s12 = sphi %s708_s12, %s904_s12  }
   0x6   : > { %s733_s18 = sadd.s32 1, %s677_s15   ;;  %s26_s19 = sadd.s32 1, %s673_s14 }
   0x7   : > { %s23_s20 = ssub.s32 %s677_s15, %s733_s18  ;;  %p33_p0 = scmp.ne.s32.totalorder %s673_s14, %s669_s13 }
   0x8   : > { %p24_p1 = scmp.eq.s32.totalorder %s23_s20, 0  ;;  %p34_p2 = scmp.eq.s32.totalorder %s677_s15, 0 }
   0x9   : > { %p39_p3 = scmp.ne.s32.totalorder %s669_s13, %s665_s12  ;;  %p40_p4 = scmp.eq.s32.totalorder %s729_s16, 0 }
   0xa   : > { %s745_s21 = scalar_select %p24_p1, %s673_s14, %s26_s19  }
   0xb   : > { %p747_p5 = por %p34_p2, %p33_p0  ;;  %p751_p6 = por %p40_p4, %p39_p3 }
   0xc   : > { %p105_p7 = scmp.eq.s32.totalorder %s729_s16, 1  ;;  %p111_p8 = scmp.eq.s32.totalorder %s484_s17, 1 }
   0xd   : > { %p536_p10 = scmp.lt.s32.totalorder %s677_s15, 2  ;;  %s137_s26 = sand.u32 1, %s673_s14  }
   0xe   : > { %p758_p11 = por %p105_p7, %p33_p0  ;;  %p762_p12 = por %p111_p8, %p39_p3 }
   0xf   : > { %s502_s27 = sshll.u32 %s677_s15, 9  ;;  %s487_s28 = sshll.u32 %s137_s26, 5 }
  0x10   : > { %s898_s24 = scalar_select %p758_p11, 1, 0 }
  0x11   : > { %s899_s25 = scalar_select %p762_p12, 1, 0 }
  0x12   : > { %s771_s4 = scalar_lea.hbm %s891_s0, %s502_s27  ;;  %s141_s5 = scalar_lea.vmem [#allocation2], %s487_s28 }
  0x13   : > { %s148_s6 = sshll.u32 %s141_s5, 4  ;;  %p775_p13 = pnand %p536_p10, %p747_p5  ;;  %s779_s6 = int_to_ptr.vmem [resolvable:$true] %s148_s6 }
  0x14   : > { %s781_s8 = scalar_lea.sflag [#allocation3], %s137_s26  ;;  %s581_s9 = scalar_lea.hbm %s771_s4, 512 }
  0x15   : > { %p582_p0 = scmp.ne.s32.totalorder %s771_s4, %s581_s9  ;;  %p583_p1 = pneg %p775_p13 }
  0x16   : > { %s586_s17 = scalar_lea.hbm %s891_s0, 1024  ;;  %p587_p4 = scmp.lt.u32.totalorder %s771_s4, %s891_s0 }
  0x17   : > { %p584_p2 = pnand %p583_p1, %p582_p0  ;;  %p588_p5 = scmp.lt.u32.totalorder %s586_s17, %s581_s9 }
  0x18   : > { %p590_p8 = scmp.lt.u32.totalorder %s581_s9, %s771_s4 }
  0x19   : > { %p585_p3 = pneg %p584_p2  ;;  %p589_p7 = por %p588_p5, %p587_p4 }
  0x1b   : > { %p591_p10 = por %p590_p8, %p589_p7 }
  0x1d   : > { %p592_p9 = pnand %p591_p10, %p585_p3 }
  0x1f   : > { %595 = shalt.err (!%p592_p9)
}
  0x20   : > { %s596_s22 = scalar_lea.vmem %s779_s6, 512  ;;  %s679_s26 = smov [#allocation2]  }
  0x21   : > { %p597_p0 = scmp.ne.s32.totalorder %s779_s6, %s596_s22  ;;  %s601_s27 = sshll.u32 %s679_s26, 4  ;;  %s602_s27 = int_to_ptr.vmem [resolvable:$false] %s601_s27 }
  0x22   : > { %s603_s28 = scalar_lea.vmem %s602_s27, 1024  ;;  %p604_p11 = scmp.lt.s32.totalorder %s779_s6, %s602_s27 }
  0x23   : > { %p599_p2 = pnand %p597_p0, %p583_p1  ;;  %p605_p4 = scmp.lt.s32.totalorder %s603_s28, %s596_s22 }
  0x25   : > { %p600_p12 = pneg %p599_p2  ;;  %p606_p5 = por %p605_p4, %p604_p11 }
  0x27   : > { %p607_p7 = pnand %p606_p5, %p600_p12 }
  0x29   : > { %610 = shalt.err (!%p607_p7)
}
  0x2a   : > { %s680_s29 = smov 256   ;;  %s681_s30 = smov 16  }
  0x2b   : > { %531 = dma.hbm_to_vmem [thread:$0]  (!%p775_p13), %s771_s4, 512, %s779_s6, %s781_s8, %s680_s29, %s680_s29, %s681_s30  }
  0x2c   : > { %p490_p9 = scmp.ge.s32.totalorder %s677_s15, 1  ;;  %p156_p1 = scmp.lt.s32.totalorder %s677_s15, 3 }
  0x2e   : > { %p157_p3 = pnand %p490_p9, %p156_p1 }
  0x2f   : > { %s812_s5 = sand.u32 (!%p157_p3), 1, %s669_s13  }
  0x30   : > { %160 = sbr.rel (%p157_p3) target bundleno = 800 (0x320), region = 32  ;;  %s491_s9 = sshll.u32 (!%p157_p3), %s812_s5, 5 }
  0x31   : > { %s163_s10 = scalar_lea.sflag (!%p157_p3), [#allocation3], %s812_s5  ;;  %s166_s11 = scalar_lea.vmem (!%p157_p3), [#allocation2], %s491_s9 }
  0x37   : > { %656 = dma.done.wait (%p751_p6), %s163_s10, 512  }
  0x38   : > { %658 = vsyncadd (%p751_p6), %s163_s10, 4294966784  ;;  %v189_v0 = vld [vmem:[%s166_s11] sm:$0xff]  ;;  %v190_v1 = vld [vmem:[%s166_s11 + $0x8] sm:$0xff]  ;;  %v682_v9 = vmov 0.0|0.0   ;;  %vm683_vm0 = vmmov 0   ;;  %v684_v10 = vmov 0.0   ;;  %v206_v11 = vlaneseq }
  0x39   : > { %v822_v2 = vld [vmem:[%s166_s11 + $0x10] sm:$0xff]  ;;  %v193_v3 = vadd.f32 %v190_v1, %v189_v0  ;;  %v824_v4 = vld [vmem:[%s166_s11 + $0x18] sm:$0xff]  ;;  %v202_v6 = vld [vmem:[%s892_s1] sm:$0xff]  ;;  %521 = vmatprep.subr.bf16.mxu0 %v682_v9  ;;  %513 = vmatprep.mubr.msk.f32.mxu0 %vm683_vm0, %v684_v10  ;;  %vm217_vm1 = vcmask 130112   ;;  %vm219_vm2 = vcmask 130048   ;;  %vm298_vm3 = vcmask 1041408  }
  0x3a   : > { %v196_v5 = vadd.f32 %v824_v4, %v822_v2  ;;  %v203_v7 = vld [vmem:[%s892_s1 + $0x8] sm:$0xff]  ;;  %516 = vmatprep.subr.mxu1 %v684_v10  ;;  %518 = vmatprep.mubr.msk.f32.mxu1 %vm683_vm0, %v684_v10  ;;  %v207_v12 = vand.u32 127, %v206_v11  ;;  %v209_v13 = vshrl.u32 %v206_v11, 7  ;;  %v293_v24 = vld [vmem:[%s893_s2] sm:$0x3]  ;;  %vm294_vm4 = vcmask 15360  }
  0x3b   : > { %194 = vadd.xlane.f32.xlu0 %v193_v3  ;;  %v522_v8 = vpack.c.bf16 %v203_v7, %v202_v6  ;;  %517 = vmatpush3.msk.msra.mxu1 %vm298_vm3, %v293_v24  ;;  %s188_s19 = scalar_lea.vmem [#allocation5], %s491_s9  ;;  %s503_s22 = sshll.u32 %s729_s16, 9 }
  0x3c   : > { %v212_v14 = vadd.s32 4294967288, %v207_v12  ;;  %v210_v16 = vsub.s32 %v207_v12, %v209_v13  ;;  %v380_v33 = vsub.s32 0, %v209_v13  ;;  %s411_s20 = sshll.u32 %s188_s19, 4  ;;  %s845_s28 = scalar_lea.hbm %s894_s3, %s503_s22  ;;  %s840_s20 = int_to_ptr.vmem [resolvable:$true] %s411_s20 }
  0x3d   : > { %523 = vmatpush3.bf16.msra.mxu0 %v522_v8  ;;  %s398_s16 = scalar_lea.sflag [#allocation4], %s812_s5  ;;  %s611_s29 = scalar_lea.vmem %s840_s20, 512 }
  0x3e   : > { %v215_v18 = vsub.s32 %v212_v14, %v209_v13  ;;  %p612_p6 = scmp.ne.s32.totalorder %s840_s20, %s611_s29  ;;  %p901_p11 = scmp.ne.s32.totalorder %s898_s24, 0 }
  0x3f   : > { %197 = vadd.xlane.f32.xlu0 %v196_v5  ;;  %s685_s30 = smov [#allocation5]  }
  0x40   : > { %p613_p12 = pnand %p612_p6, %p901_p11  ;;  %s615_s9 = sshll.u32 %s685_s30, 4  ;;  %s616_s9 = int_to_ptr.vmem [resolvable:$false] %s615_s9 }
  0x41   : > { %s617_s10 = scalar_lea.vmem %s616_s9, 1024  ;;  %p618_p8 = scmp.lt.s32.totalorder %s840_s20, %s616_s9 }
  0x42   : > { %p614_p13 = pneg %p613_p12  ;;  %p619_p10 = scmp.lt.s32.totalorder %s617_s10, %s611_s29 }
  0x44   : > { %p620_p0 = por %p619_p10, %p618_p8 }
  0x46   : > { %p621_p2 = pnand %p620_p0, %p614_p13 }
  0xc8   : > { %v195_v15 = vpop.xlane.xlu0 %194 }
  0xc9   : > { %v200_v17 = vmul.f32 0.00390625, %v195_v15 }
  0xcb   : > { %v211_v21 = vrot.slane %v200_v17, %v210_v16 }
  0xcc   : > { %v198_v19 = vpop.xlane.xlu0 %197 }
  0xcd   : > { %v201_v20 = vmul.f32 0.00390625, %v198_v19 }
  0xcf   : > { %v216_v22 = vrot.slane %v201_v20, %v215_v18 }
  0xd1   : > { %v218_v23 = vsel %vm217_vm1, %v216_v22, %v211_v21 }
  0xd2   : > { %514 = vmatmul.mubr.msk.f32.vlgmr.msra.gmra.mrb[0].mxu0 %vm219_vm2, %v218_v23 }
 0x1a5   : > { %v288_v25 = vpop.f32.mrb[0].mxu0 }
 0x1a6   : > { %v292_v26 = vmax.f32 %v288_v25, 0.0  ;;  %v515_v27 = vpop.f32.mrb[1].mxu0 }
 0x1a8   : > { %519 = vmatmul.mubr.msk.f32.vlgmr.msra.gmra.mrb[0].mxu1 %vm294_vm4, %v292_v26 }
 0x27b   : > { %v368_v28 = vpop.f32.mrb[0].mxu1 }
 0x27c   : > { %v496_v29 = vmul.f32 -1.442695, %v368_v28  ;;  %v520_v30 = vpop.f32.mrb[1].mxu1 }
 0x27e   : > { %577 = vpow2.f32 %v496_v29 }
 0x288   : > { %v578_v31 = vpop.eup %577 }
 0x289   : > { %v375_v32 = vadd.f32 1.0, %v578_v31 }
 0x28b   : > { %579 = vrcp.f32 %v375_v32 }
 0x295   : > { %v580_v34 = vpop.eup %579 }
 0x296   : > { %v381_v35 = vrot.slane %v580_v34, %v380_v33 }
 0x298   : > { %383 = vbcast.lane.b32.xlu1 %v381_v35, 256 }
 0x29c   : > { %387 = vbcast.lane.b32.xlu1 %v381_v35, 264 }
 0x30a   : > { %v384_v36 = vpop.permute.xlu1 %383 }
 0x30b   : > { %v389_v37 = vmul.f32 %v384_v36, %v189_v0  ;;  %v390_v38 = vmul.f32 %v384_v36, %v190_v1 }
 0x30d   : > { %393 = vst [vmem:[%s188_s19] sm:$0xff] %v389_v37  ;;  %394 = vst [vmem:[%s188_s19 + $0x8] sm:$0xff] %v390_v38 }
 0x30e   : > { %v388_v39 = vpop.permute.xlu1 %387 }
 0x30f   : > { %v391_v40 = vmul.f32 %v388_v39, %v822_v2  ;;  %v392_v41 = vmul.f32 %v388_v39, %v824_v4 }
 0x311   : > { %395 = vst [vmem:[%s188_s19 + $0x10] sm:$0xff] %v391_v40  ;;  %396 = vst [vmem:[%s188_s19 + $0x18] sm:$0xff] %v392_v41 }
 0x312   : > { %624 = shalt.err (!%p621_p2)
}
 0x313   : > { %s625_s11 = scalar_lea.hbm %s845_s28, 512  ;;  %s629_s7 = scalar_lea.hbm %s894_s3, 1024 }
 0x314   : > { %p626_p4 = scmp.ne.s32.totalorder %s845_s28, %s625_s11  ;;  %p630_p9 = scmp.lt.u32.totalorder %s845_s28, %s894_s3 }
 0x315   : > { %p631_p1 = scmp.lt.u32.totalorder %s629_s7, %s625_s11  ;;  %p633_p6 = scmp.lt.u32.totalorder %s625_s11, %s845_s28 }
 0x316   : > { %p627_p5 = pnand %p626_p4, %p901_p11 }
 0x317   : > { %p632_p3 = por %p631_p1, %p630_p9 }
 0x318   : > { %p628_p7 = pneg %p627_p5 }
 0x319   : > { %p634_p12 = por %p633_p6, %p632_p3 }
 0x31b   : > { %p635_p13 = pnand %p634_p12, %p628_p7 }
 0x31d   : > { %638 = shalt.err (!%p635_p13)
}
 0x31e   : > { %s686_s17 = smov 256   ;;  %s687_s19 = smov 16  }
 0x31f   : > { %526 = dma.vmem_to_hbm [thread:$0]  (%p901_p11), %s840_s20, 512, %s845_s28, %s398_s16, %s686_s17, %s686_s17, %s687_s19  }
 0x320 PF: > { %s426_s22 = sand.u32 1, %s665_s12   ;;  %p902_p8 = scmp.ne.s32.totalorder %s899_s25, 0 }
 0x321   : > { %p903_p10 = scmp.ge.s32.totalorder %s677_s15, 2  ;;  %s427_s26 = scalar_lea.sflag [#allocation4], %s426_s22 }
 0x323   : > { %p533_p0 = pnand %p903_p10, %p902_p8 }
 0x325   : > { %660 = dma.done.wait (!%p533_p0), %s427_s26, 512  }
 0x326   : > { %662 = vsyncadd (!%p533_p0), %s427_s26, 4294966784  ;;  %p16_p2 = scmp.ge.s32.totalorder %s733_s18, 4   ;;  %s904_s12 = smov %s669_s13 }
 0x327   : > { %s905_s13 = smov %s673_s14  ;;  %s906_s14 = smov %s745_s21 }
 0x328   : > { %s907_s15 = smov %s733_s18  ;;  %18 = sbr.rel (!%p16_p2) target bundleno = 5 (0x5), region = 77 }
 0x32f   :  { %432 = vsyncpa [#allocation3], 1 }
 0x330   :  { %434 = vsyncpa [#allocation3 + $0x1], 1 }
 0x331   :  { %435 = vsyncpa [#allocation4], 1 }
 0x332   :  { %437 = vsyncpa [#allocation4 + $0x1], 1 }

</bundles_post_ra>
